<compile_context>
chip_gen: v7x
topology: tpu7x:2x2x1
jax: 0.10.0
libtpu: 0.0.40
codegen_flags: <defaults>
</compile_context>

<pallas_src>
import functools
import math

import jax
import jax.numpy as jnp
from jax.experimental import pallas as pl
from jax.experimental.pallas import tpu as pltpu


KTILE_MAX = 8192            # upper bound on frames per grid step
KTILE_VMEM_BUDGET = 16 << 20  # bytes for double-buffered in+out blocks


def encoder_kernel(frames_ref, w_ref, out_ref):
    # frames_ref: (1, L, Kt)  im2col slab, time frames on lanes
    # w_ref     : (N, L)      conv1d_U weight (input-channel dim squeezed)
    # out_ref   : (1, N, Kt)  relu(conv) output, channel-major == PyTorch [M, N, K]
    acc = jnp.dot(w_ref[...], frames_ref[0], preferred_element_type=jnp.float32)
    out_ref[0] = jnp.maximum(acc, 0.0).astype(out_ref.dtype)


def _pick_ktile(K, N, L, in_bytes, out_bytes):
    """Largest lane-dense K tile whose double-buffered blocks fit the budget."""
    per_frame = 2 * (N * out_bytes + L * in_bytes)     # double-buffered in + out
    kt = KTILE_VMEM_BUDGET // per_frame
    kt = max(128, min(KTILE_MAX, (kt // 128) * 128))   # multiple of 128
    return kt


@functools.partial(jax.jit, static_argnames=("L", "compute_dtype", "out_dtype"))
def audio_encoder(x, w, L, compute_dtype=jnp.bfloat16, out_dtype=jnp.float32):
    """x: [M, T] waveform; w: [N, 1, L] = Conv1d(1, N, L, stride=L//2, bias=False).weight."""
    assert L % 2 == 0, "stride = L // 2 fast path assumes even L"
    M, T = x.shape
    N = w.shape[0]
    S = L // 2
    K = (T - L) // S + 1
    assert K >= 1, "input shorter than one frame"

    in_bytes = jnp.dtype(compute_dtype).itemsize
    out_bytes = jnp.dtype(out_dtype).itemsize

    # --- K tiling: full-K single block when it fits, else 128-multiple tiles ---
    kt_cap = _pick_ktile(K, N, L, in_bytes, out_bytes)
    if K <= kt_cap:
        kt, nk, kpad = K, 1, K                         # full-dim block, no padding
    else:
        kt = kt_cap
        nk = pl.cdiv(K, kt)
        kpad = nk * kt                                 # pad input frames only

    # --- wrapper glue: build ONE [M, L, kpad] im2col slab, K on lanes --------
    # Pad the raw waveform (cheap) so framing yields kpad frames; the OUTPUT is
    # never padded -> no post-kernel slice.  The ragged final output block is
    # masked by Pallas on store and the kernel never reads out_ref back.
    need = (kpad + 1) * S
    take = min(T, need)
    xw = x[:, :take].astype(compute_dtype)
    if take < need:
        xw = jnp.pad(xw, ((0, 0), (0, need - take)))
    xs_t = jnp.transpose(xw.reshape(M, kpad + 1, S), (0, 2, 1))   # [M, S, kpad+1]
    frames = jnp.concatenate(
        [xs_t[:, :, :kpad], xs_t[:, :, 1:]], axis=1)              # [M, L, kpad]

    w2 = w.reshape(N, L).astype(compute_dtype)

    # --- explicit VMEM budget (v5e scoped default is only 16 MiB) ------------
    vmem_bytes = (2 * L * kt * in_bytes            # double-buffered input block
                  + 2 * N * kt * out_bytes         # double-buffered output block
                  + 2 * N * L * in_bytes           # resident weight
                  + (8 << 20))                     # matmul temporaries / margin

    cost = pl.CostEstimate(
        flops=2 * M * N * K * L,
        transcendentals=0,
        bytes_accessed=(M * L * kpad * in_bytes + N * L * in_bytes
                        + M * N * K * out_bytes),
    )

    out = pl.pallas_call(
        encoder_kernel,
        out_shape=jax.ShapeDtypeStruct((M, N, K), out_dtype),
        grid=(M, nk),
        in_specs=[
            pl.BlockSpec((1, L, kt), lambda m, k: (m, 0, k)),
            pl.BlockSpec((N, L), lambda m, k: (0, 0)),
        ],
        out_specs=pl.BlockSpec((1, N, kt), lambda m, k: (m, 0, k)),
        compiler_params=pltpu.CompilerParams(
            dimension_semantics=("parallel", "parallel"),
            vmem_limit_bytes=int(vmem_bytes)),
        cost_estimate=cost,
    )(frames, w2)

    return out


def reference_forward(x, w, L):
    """Pure-JAX f32 reference matching the PyTorch module semantics."""
    S = L // 2
    M, T = x.shape
    K = (T - L) // S + 1
    idx = jnp.arange(K)[:, None] * S + jnp.arange(L)[None, :]   # [K, L]
    frames = x[:, idx]                                          # [M, K, L]
    y = jnp.einsum("mkl,nl->mnk", frames, w[:, 0, :])           # Conv1d(1,N,L,stride=S)
    return jax.nn.relu(y)


if __name__ == "__main__":
    # Module hyper-params (small): audioEncoder(L=16, N=32)
    L, N = 16, 32
    M = 2
    K = 16
    T = (K - 1) * (L // 2) + L      # 136 samples -> K = 16 frames

    key = jax.random.PRNGKey(0)
    k1, k2 = jax.random.split(key)
    x = jax.random.normal(k1, (M, T), dtype=jnp.float32)
    # Deterministic weight init (shape from nn.Conv1d(1, N, L, stride=L//2, bias=False)).
    w = jax.random.normal(k2, (N, 1, L), dtype=jnp.float32) * (1.0 / math.sqrt(L))

    ref = reference_forward(x, w, L)

    # f32 compute + f32 out: exact check of kernel math / framing / layout.
    out_f32 = audio_encoder(x, w, L, compute_dtype=jnp.float32,
                            out_dtype=jnp.float32)
    jax.block_until_ready(out_f32)
    assert out_f32.shape == (M, N, K)
    assert jnp.allclose(out_f32, ref, atol=1e-5, rtol=1e-5), "f32 mismatch vs reference"

    # bf16 MXU path + bf16 writeback (performance path): quantization tolerance.
    out_bf16 = audio_encoder(x, w, L, compute_dtype=jnp.bfloat16,
                             out_dtype=jnp.bfloat16)
    jax.block_until_ready(out_bf16)
    assert out_bf16.shape == (M, N, K)
    assert jnp.allclose(out_bf16.astype(jnp.float32), ref,
                        atol=5e-2, rtol=5e-2), "bf16 mismatch vs reference"

    print("KERNEL_OK")
</pallas_src>

<mosaic_0001>
module attributes {stable_mosaic.version = 11 : i64} {
  func.func @encoder_kernel(%arg0: i32, %arg1: i32, %arg2: memref<1x16x16xf32, #tpu.memory_space<vmem>>, %arg3: memref<32x16xf32, #tpu.memory_space<vmem>>, %arg4: memref<1x32x16xf32, #tpu.memory_space<vmem>>) attributes {dimension_semantics = [#tpu.dimension_semantics<parallel>, #tpu.dimension_semantics<parallel>], iteration_bounds = array<i64: 2, 1>, scalar_prefetch = 0 : i64, scratch_operands = 0 : i64, tpu.core_type = #tpu.core_type<tc>, window_params = [{transform_indices = @transform_0, window_bounds = array<i64: 1, 16, 16>}, {pipeline_mode = #tpu.pipeline_mode<synchronous>, transform_indices = @transform_1, window_bounds = array<i64: 32, 16>}, {transform_indices = @transform_2, window_bounds = array<i64: 1, 32, 16>}]} {
    %c0 = arith.constant 0 : index
    %c0_0 = arith.constant 0 : index
    %0 = vector.load %arg3[%c0, %c0_0] : memref<32x16xf32, #tpu.memory_space<vmem>>, vector<32x16xf32>
    %c0_1 = arith.constant 0 : index
    %c0_2 = arith.constant 0 : index
    %c0_3 = arith.constant 0 : index
    %1 = vector.load %arg2[%c0_1, %c0_2, %c0_3] : memref<1x16x16xf32, #tpu.memory_space<vmem>>, vector<1x16x16xf32>
    %2 = vector.shape_cast %1 : vector<1x16x16xf32> to vector<16x16xf32>
    %cst = arith.constant dense<0.000000e+00> : vector<32x16xf32>
    %3 = tpu.matmul %0, %2, %cst {dimension_numbers = #tpu.dot_dimension_numbers<[1], [0], [0], [1], [0, 0, 1, 1], [], []>} : vector<32x16xf32>, vector<16x16xf32>, vector<32x16xf32> -> vector<32x16xf32>
    %cst_4 = arith.constant 0.000000e+00 : f32
    %4 = vector.broadcast %cst_4 : f32 to vector<32x16xf32>
    %5 = arith.maximumf %3, %4 : vector<32x16xf32>
    %c0_5 = arith.constant 0 : index
    %c0_6 = arith.constant 0 : index
    %c0_7 = arith.constant 0 : index
    %6 = vector.load %arg4[%c0_5, %c0_6, %c0_7] : memref<1x32x16xf32, #tpu.memory_space<vmem>>, vector<1x32x16xf32>
    %7 = vector.shape_cast %6 : vector<1x32x16xf32> to vector<32x16xf32>
    %8 = vector.shape_cast %5 : vector<32x16xf32> to vector<1x32x16xf32>
    tpu.vector_store %arg4[%c0_5, %c0_6, %c0_7], %8 {strides = array<i32>} : memref<1x32x16xf32, #tpu.memory_space<vmem>>, vector<1x32x16xf32>,
    return
  }
  func.func @transform_0(%arg0: i32, %arg1: i32) -> (i32, i32, i32) {
    %c0_i32 = arith.constant 0 : i32
    %c0_i32_0 = arith.constant 0 : i32
    return %arg0, %c0_i32, %arg1 : i32, i32, i32
  }
  func.func @transform_1(%arg0: i32, %arg1: i32) -> (i32, i32) {
    %c0_i32 = arith.constant 0 : i32
    %c0_i32_0 = arith.constant 0 : i32
    %c0_i32_1 = arith.constant 0 : i32
    return %c0_i32, %c0_i32_0 : i32, i32
  }
  func.func @transform_2(%arg0: i32, %arg1: i32) -> (i32, i32, i32) {
    %c0_i32 = arith.constant 0 : i32
    %c0_i32_0 = arith.constant 0 : i32
    return %arg0, %c0_i32, %arg1 : i32, i32, i32
  }
}

</mosaic_0001>

<bundles_post_ra>
// kernel: audio_encoder.1
= control target key start
LH: loop header
LB: loop body
LE: loop exit
PB: predicated region body
PF: predicated region fallthrough
CT: control target
= control target key end

     0   :  { %s472_s9 = smov 0   ;;  %s474_s10 = smov 0   ;;  %s525_s0 = inlined_call_operand.vmem [shape: f32[2,16,16], index: 0, kind: input, shape index: {}]   ;;  %s526_s1 = inlined_call_operand.vmem [shape: f32[32,16], index: 1, kind: input, shape index: {}]   ;;  %s527_s2 = inlined_call_operand.vmem [shape: f32[2,32,16], index: 2, kind: output, shape index: {}]  }
   0x1   :  { %s476_s11 = smov 0  }
   0x2 LB: > { %s24_s12 = sadd.s32 1, %s451_s10  ;;  %p374_p0 = scmp.ge.s32.totalorder %s455_s11, 1  ;;  %s455_s11 = sphi %s476_s11, %s12_s11   ;;  %s451_s10 = sphi %s474_s10, %s529_s10   ;;  %s447_s9 = sphi %s472_s9, %s528_s9  }
   0x3   : > { %p26_p1 = scmp.ge.s32.totalorder %s24_s12, 2  ;;  %p131_p2 = scmp.lt.s32.totalorder %s455_s11, 3 }
   0x5   : > { %s531_s12 = smov (%p26_p1, %s24_s12), 0  ;;  %p132_p3 = pnand %p374_p0, %p131_p2 }
   0x6   : > { %p159_p4 = scmp.lt.s32.totalorder (!%p132_p3), %s447_s9, 1  ;;  %v175_v0 = vld [vmem:[%s526_s1] sm:$0xff] (!%p132_p3)  ;;  %vm181_vm0 = vcmask (!%p132_p3), 130048   ;;  %v177_v1 = vld [vmem:[%s526_s1 + $0x10] sm:$0xff] (!%p132_p3)  ;;  %v176_v5 = vld [vmem:[%s526_s1 + $0x8] sm:$0xff] (!%p132_p3) }
   0x7   : > { %135 = sbr.rel (%p132_p3) target bundleno = 240 (0xf0), region = 28  ;;  %397 = vmatprep.mubr.msk.f32.mxu0 (!%p132_p3), %vm181_vm0, %v175_v0  ;;  %400 = vmatprep.mubr.msk.f32.mxu1 (!%p132_p3), %vm181_vm0, %v177_v1  ;;  %v178_v6 = vld [vmem:[%s526_s1 + $0x18] sm:$0xff] (!%p132_p3) }
   0xe   : > { %s533_s9 = smov (!%p159_p4, %s447_s9), 1 }
   0xf   : > { %s385_s17 = sshll.u32 %s533_s9, 4  ;;  %s386_s25 = sshll.u32 %s533_s9, 5 }
  0x10   : > { %s166_s20 = scalar_lea.vmem %s525_s0, %s385_s17  ;;  %s174_s28 = scalar_lea.vmem %s527_s2, %s386_s25 }
  0x11   : > { %v179_v2 = vld [vmem:[%s166_s20] sm:$0xff]  ;;  %v180_v3 = vld [vmem:[%s166_s20 + $0x8] sm:$0xff] }
  0x12   : > { %v403_v4 = vpack.c.bf16 %v180_v3, %v179_v2 }
  0x14   : > { %404 = vmatprep.subr.bf16.mxu0 %v403_v4  ;;  %407 = vmatprep.subr.bf16.mxu1 %v403_v4 }
  0x15   : > { %406 = vmatpush3.bf16.msra.mxu0 %v403_v4  ;;  %408 = vmatpush3.bf16.msra.mxu1 %v403_v4 }
  0x18   : > { %398 = vmatmul.mubr.msk.f32.vlgmr.msra.gmra.mrb[0].mxu0 %vm181_vm0, %v176_v5  ;;  %401 = vmatmul.mubr.msk.f32.vlgmr.msra.gmra.mrb[0].mxu1 %vm181_vm0, %v178_v6 }
  0xeb   : > { %v399_v7 = vpop.f32.mrb[0].mxu0  ;;  %v402_v8 = vpop.f32.mrb[0].mxu1 }
  0xec   : > { %v280_v9 = vmax.f32 %v399_v7, 0.0  ;;  %v282_v10 = vmax.f32 %v402_v8, 0.0  ;;  %v260_v11 = vpop.f32.mrb[1].mxu0  ;;  %v270_v12 = vpop.f32.mrb[1].mxu1 }
  0xed   : > { %v279_v13 = vmax.f32 %v260_v11, 0.0  ;;  %v281_v14 = vmax.f32 %v270_v12, 0.0 }
  0xee   : > { %284 = vst.msk [vmem:[%s174_s28 + $0x8] sm:$0xff] %vm181_vm0, %v280_v9  ;;  %286 = vst.msk [vmem:[%s174_s28 + $0x18] sm:$0xff] %vm181_vm0, %v282_v10 }
  0xef   : > { %283 = vst.msk [vmem:[%s174_s28] sm:$0xff] %vm181_vm0, %v279_v13  ;;  %285 = vst.msk [vmem:[%s174_s28 + $0x10] sm:$0xff] %vm181_vm0, %v281_v14 }
  0xf0 PF: > { %s12_s11 = sadd.s32 1, %s455_s11   ;;  %s528_s9 = smov %s451_s10 }
  0xf1   : > { %p9_p5 = scmp.ge.s32.totalorder %s12_s11, 4   ;;  %s529_s10 = smov %s531_s12 }
  0xf3   :  { %11 = sbr.rel (!%p9_p5) target bundleno = 2 (0x2), region = 58 }

</bundles_post_ra>
